<compile_context>
chip_gen: v6e
topology: v6e:2x2x1
jax: 0.10.0
libtpu: 0.0.40
codegen_flags: <defaults>
</compile_context>

<pallas_src>
import functools

import jax
import jax.numpy as jnp
from jax.experimental import pallas as pl
from jax.experimental.pallas import tpu as pltpu

EPS = 1e-5  # PyTorch BatchNorm default eps


# ------------------------------ small helpers ------------------------------- #

def _round_up(x, m):
    return ((x + m - 1) // m) * m


def _pick_tk(kp):
    """Choose a K tile (multiple of 128) that divides the padded K."""
    if kp <= 768:
        return kp
    for tk in (512, 384, 256, 128):
        if kp % tk == 0:
            return tk
    return 128  # unreachable: kp is a multiple of 128


# ------------------------------ Pallas kernels ------------------------------ #

def _bn_epilogue(y, col_sum, col_sq, gamma, beta, inv_m, residual, relu):
    """Shared BN(batch stats) epilogue in f32: normalize, scale/shift, (+res)(+ReLU)."""
    mean = col_sum * inv_m
    var = jnp.maximum(col_sq * inv_m - mean * mean, 0.0)   # single-pass E[y^2]-mean^2
    scale = gamma * jax.lax.rsqrt(var + EPS)
    shift = beta - mean * scale
    out = y * scale + shift
    if residual is not None:
        out = out + residual
    if relu:
        out = jnp.maximum(out, 0.0)
    return out


def _conv_bn_fused_kernel(*refs, inv_m, relu, has_residual):
    """grid=(n_k,). bf16 matmul into f32 VMEM accumulator; BN epilogue at last K step."""
    if has_residual:
        a_ref, w_ref, g_ref, b_ref, r_ref, o_ref, acc_ref = refs
    else:
        a_ref, w_ref, g_ref, b_ref, o_ref, acc_ref = refs
        r_ref = None

    @pl.when(pl.program_id(0) == 0)
    def _():
        acc_ref[...] = jnp.zeros_like(acc_ref)

    acc_ref[...] += jnp.dot(a_ref[...], w_ref[...],
                            preferred_element_type=jnp.float32)

    @pl.when(pl.program_id(0) == pl.num_programs(0) - 1)
    def _():
        y = acc_ref[...]
        col_sum = jnp.sum(y, axis=0, keepdims=True)
        col_sq = jnp.sum(y * y, axis=0, keepdims=True)
        res = r_ref[...] if has_residual else None
        o_ref[...] = _bn_epilogue(y, col_sum, col_sq, g_ref[...], b_ref[...],
                                  inv_m, res, relu)


def _matmul_stats_kernel(a_ref, w_ref, y_ref, s_ref, acc_ref):
    """grid=(n_m, n_k). Emits raw matmul tile + per-tile column sum / sum-of-squares."""
    @pl.when(pl.program_id(1) == 0)
    def _():
        acc_ref[...] = jnp.zeros_like(acc_ref)

    acc_ref[...] += jnp.dot(a_ref[...], w_ref[...],
                            preferred_element_type=jnp.float32)

    @pl.when(pl.program_id(1) == pl.num_programs(1) - 1)
    def _():
        y = acc_ref[...]
        y_ref[...] = y
        # Rows 0/1 of this tile's 8-row stats block hold sum / sum-of-squares.
        s_ref[0:1, :] = jnp.sum(y, axis=0, keepdims=True)
        s_ref[1:2, :] = jnp.sum(y * y, axis=0, keepdims=True)


def _bn_finalize_kernel(*refs, inv_m, relu, has_residual):
    """grid=(n_m,) parallel. Normalize + scale/shift (+residual)(+ReLU) one M tile."""
    if has_residual:
        y_ref, s_ref, g_ref, b_ref, r_ref, o_ref = refs
    else:
        y_ref, s_ref, g_ref, b_ref, o_ref = refs
        r_ref = None
    res = r_ref[...] if has_residual else None
    o_ref[...] = _bn_epilogue(y_ref[...], s_ref[0:1, :], s_ref[1:2, :],
                              g_ref[...], b_ref[...], inv_m, res, relu)


def _linear_bn1d_kernel(x_ref, w_ref, bias_ref, g_ref, b_ref, o_ref, *, inv_m):
    """Fused Linear (x @ W^T + b) + BatchNorm1d (training-mode batch stats)."""
    y = jnp.dot(x_ref[...], w_ref[...],
                preferred_element_type=jnp.float32) + bias_ref[...]
    o_ref[...] = _bn_epilogue(y,
                              jnp.sum(y, axis=0, keepdims=True),
                              jnp.sum(y * y, axis=0, keepdims=True),
                              g_ref[...], b_ref[...], inv_m, None, False)


# ------------------------------- glue (JAX) --------------------------------- #

def _im2col(x, kh, kw, stride, pad):
    """x: NHWC -> (N*Ho*Wo, kh*kw*C) patches, K ordered (kh, kw, c)."""
    n, h, w, c = x.shape
    xp = jnp.pad(x, ((0, 0), (pad, pad), (pad, pad), (0, 0)))
    ho = (h + 2 * pad - kh) // stride + 1
    wo = (w + 2 * pad - kw) // stride + 1
    cols = []
    for i in range(kh):
        for j in range(kw):
            cols.append(xp[:, i:i + stride * ho:stride, j:j + stride * wo:stride, :])
    a = jnp.stack(cols, axis=3)                       # (n, ho, wo, kh*kw, c)
    return a.reshape(n * ho * wo, kh * kw * c), (n, ho, wo)


def conv_bn(x, w_hwio, gamma, beta, stride, pad, relu=True, residual=None):
    """Conv2d(no bias) + BatchNorm2d(batch stats)(+residual)(+ReLU) in Pallas."""
    kh, kw, cin, cout = w_hwio.shape
    a, (n, ho, wo) = _im2col(x, kh, kw, stride, pad)
    m, k = a.shape

    # Lane-dense / MXU-friendly padded sizes and tiles.
    kp = _round_up(k, 128)
    cn = _round_up(cout, 128)
    tm = min(256, _round_up(m, 8))
    mp = _round_up(m, tm)
    tk = _pick_tk(kp)
    n_m, n_k = mp // tm, kp // tk
    inv_m = 1.0 / m                      # true row count (padded rows contribute 0)
    has_res = residual is not None

    a_p = jnp.pad(a, ((0, mp - m), (0, kp - k))).astype(jnp.bfloat16)
    w_p = jnp.pad(w_hwio.reshape(k, cout),
                  ((0, kp - k), (0, cn - cout))).astype(jnp.bfloat16)
    g_p = jnp.pad(gamma, (0, cn - cout),
                  constant_values=1.0).reshape(1, cn).astype(jnp.float32)
    b_p = jnp.pad(beta, (0, cn - cout)).reshape(1, cn).astype(jnp.float32)
    if has_res:
        r_p = jnp.pad(residual.reshape(m, cout),
                      ((0, mp - m), (0, cn - cout))).astype(jnp.float32)

    if n_m == 1:
        # Whole M fits one tile: fully fused conv + BN (+res)(+ReLU), grid over K.
        in_specs = [
            pl.BlockSpec((mp, tk), lambda kk: (0, kk)),
            pl.BlockSpec((tk, cn), lambda kk: (kk, 0)),
            pl.BlockSpec((1, cn), lambda kk: (0, 0)),
            pl.BlockSpec((1, cn), lambda kk: (0, 0)),
        ]
        inputs = [a_p, w_p, g_p, b_p]
        if has_res:
            in_specs.append(pl.BlockSpec((mp, cn), lambda kk: (0, 0)))
            inputs.append(r_p)
        y_p = pl.pallas_call(
            functools.partial(_conv_bn_fused_kernel, inv_m=inv_m, relu=relu,
                              has_residual=has_res),
            grid=(n_k,),
            in_specs=in_specs,
            out_specs=pl.BlockSpec((mp, cn), lambda kk: (0, 0)),
            out_shape=jax.ShapeDtypeStruct((mp, cn), jnp.float32),
            scratch_shapes=[pltpu.VMEM((mp, cn), jnp.float32)],
            compiler_params=pltpu.CompilerParams(
                dimension_semantics=("arbitrary",)),
        )(*inputs)
    else:
        # Phase 1: tiled matmul, per-M-tile partial column stats.
        y_raw, part = pl.pallas_call(
            _matmul_stats_kernel,
            grid=(n_m, n_k),
            in_specs=[
                pl.BlockSpec((tm, tk), lambda mi, kk: (mi, kk)),
                pl.BlockSpec((tk, cn), lambda mi, kk: (kk, 0)),
            ],
            out_specs=(
                pl.BlockSpec((tm, cn), lambda mi, kk: (mi, 0)),
                pl.BlockSpec((8, cn), lambda mi, kk: (mi, 0)),
            ),
            out_shape=(
                jax.ShapeDtypeStruct((mp, cn), jnp.float32),
                jax.ShapeDtypeStruct((n_m * 8, cn), jnp.float32),
            ),
            scratch_shapes=[pltpu.VMEM((tm, cn), jnp.float32)],
            compiler_params=pltpu.CompilerParams(
                dimension_semantics=("parallel", "arbitrary")),
        )(a_p, w_p)
        # Tiny cross-tile stat reduction (rows 0/1 of each 8-row block are sum/sumsq).
        stats = jnp.sum(part.reshape(n_m, 8, cn)[:, :2, :], axis=0)   # (2, cn)

        # Phase 2: normalize + scale/shift (+residual)(+ReLU), tiled over M (parallel).
        in_specs = [
            pl.BlockSpec((tm, cn), lambda mi: (mi, 0)),
            pl.BlockSpec((2, cn), lambda mi: (0, 0)),
            pl.BlockSpec((1, cn), lambda mi: (0, 0)),
            pl.BlockSpec((1, cn), lambda mi: (0, 0)),
        ]
        inputs = [y_raw, stats, g_p, b_p]
        if has_res:
            in_specs.append(pl.BlockSpec((tm, cn), lambda mi: (mi, 0)))
            inputs.append(r_p)
        y_p = pl.pallas_call(
            functools.partial(_bn_finalize_kernel, inv_m=inv_m, relu=relu,
                              has_residual=has_res),
            grid=(n_m,),
            in_specs=in_specs,
            out_specs=pl.BlockSpec((tm, cn), lambda mi: (mi, 0)),
            out_shape=jax.ShapeDtypeStruct((mp, cn), jnp.float32),
            compiler_params=pltpu.CompilerParams(
                dimension_semantics=("parallel",)),
        )(*inputs)

    return y_p[:m, :cout].reshape(n, ho, wo, cout)


def maxpool_3x3_s2_p1(x):
    """MaxPool2d(kernel=3, stride=2, padding=1) as a fused jnp.maximum tap tree
    (per performance review: no 9x-stacked HBM tensor, no extra Pallas call)."""
    n, h, w, c = x.shape
    neg = jnp.finfo(x.dtype).min
    xp = jnp.pad(x, ((0, 0), (1, 1), (1, 1), (0, 0)), constant_values=neg)
    ho = (h + 2 - 3) // 2 + 1
    wo = (w + 2 - 3) // 2 + 1
    out = None
    for i in range(3):
        for j in range(3):
            tap = xp[:, i:i + 2 * ho:2, j:j + 2 * wo:2, :]
            out = tap if out is None else jnp.maximum(out, tap)
    return out


def linear_bn1d(feats, lin_wt, lin_b, bn_g, bn_b):
    """Linear(512, E) + BatchNorm1d(E) fused in one Pallas kernel (E padded to 128)."""
    m, _ = feats.shape
    e = lin_wt.shape[1]
    ep = _round_up(e, 128)
    x = feats.astype(jnp.bfloat16)
    w = jnp.pad(lin_wt, ((0, 0), (0, ep - e))).astype(jnp.bfloat16)
    bias = jnp.pad(lin_b, (0, ep - e)).reshape(1, ep).astype(jnp.float32)
    g = jnp.pad(bn_g, (0, ep - e), constant_values=1.0).reshape(1, ep).astype(jnp.float32)
    b = jnp.pad(bn_b, (0, ep - e)).reshape(1, ep).astype(jnp.float32)
    out = pl.pallas_call(
        functools.partial(_linear_bn1d_kernel, inv_m=1.0 / m),
        grid=(1,),
        in_specs=[pl.BlockSpec(x.shape, lambda i: (0, 0)),
                  pl.BlockSpec(w.shape, lambda i: (0, 0)),
                  pl.BlockSpec(bias.shape, lambda i: (0, 0)),
                  pl.BlockSpec(g.shape, lambda i: (0, 0)),
                  pl.BlockSpec(b.shape, lambda i: (0, 0))],
        out_specs=pl.BlockSpec((m, ep), lambda i: (0, 0)),
        out_shape=jax.ShapeDtypeStruct((m, ep), jnp.float32),
    )(x, w, bias, g, b)
    return out[:, :e]


# ------------------------------ parameter init ------------------------------ #

class KeyGen:
    def __init__(self, seed):
        self.key = jax.random.PRNGKey(seed)

    def __call__(self):
        self.key, sub = jax.random.split(self.key)
        return sub


def conv_w(kg, kh, kw, cin, cout):
    fan_in = kh * kw * cin
    return (jax.random.normal(kg(), (kh, kw, cin, cout), jnp.float32)
            * jnp.sqrt(2.0 / fan_in))


def bn_params(c):
    return (jnp.ones((c,), jnp.float32), jnp.zeros((c,), jnp.float32))


def init_resnet34_params(kg):
    p = {"conv1": conv_w(kg, 7, 7, 3, 64), "bn1": bn_params(64)}
    stages = []
    in_c = 64
    cfg = [(64, 3, 1), (128, 4, 2), (256, 6, 2), (512, 3, 2)]  # ResNet-34 BasicBlocks
    for out_c, n_blocks, stride in cfg:
        blocks = []
        for bi in range(n_blocks):
            s = stride if bi == 0 else 1
            blk = {
                "conv1": conv_w(kg, 3, 3, in_c, out_c), "bn1": bn_params(out_c),
                "conv2": conv_w(kg, 3, 3, out_c, out_c), "bn2": bn_params(out_c),
                "stride": s,
            }
            if s != 1 or in_c != out_c:
                blk["down_conv"] = conv_w(kg, 1, 1, in_c, out_c)
                blk["down_bn"] = bn_params(out_c)
            blocks.append(blk)
            in_c = out_c
        stages.append(blocks)
    p["stages"] = stages
    return p


# ------------------------------ forward pass -------------------------------- #

def feature_extractor_forward(images_nchw, params, lin_wt, lin_b, bn_g, bn_b):
    """images_nchw: (N, 3, H, W) float32; returns (N, embedding_dim) float32."""
    x = jnp.transpose(images_nchw, (0, 2, 3, 1))  # NCHW -> NHWC
    # stem
    x = conv_bn(x, params["conv1"], *params["bn1"], stride=2, pad=3, relu=True)
    x = maxpool_3x3_s2_p1(x)
    # residual stages
    for blocks in params["stages"]:
        for blk in blocks:
            identity = x
            y = conv_bn(x, blk["conv1"], *blk["bn1"],
                        stride=blk["stride"], pad=1, relu=True)
            if "down_conv" in blk:
                identity = conv_bn(x, blk["down_conv"], *blk["down_bn"],
                                   stride=blk["stride"], pad=0, relu=False)
            x = conv_bn(y, blk["conv2"], *blk["bn2"],
                        stride=1, pad=1, residual=identity)
    # global average pool (tiny glue: (N, H', W', 512) -> (N, 512))
    feats = jnp.mean(x, axis=(1, 2))
    # head: Linear(512, E) + BatchNorm1d(E) fused in Pallas
    return linear_bn1d(feats, lin_wt, lin_b, bn_g, bn_b)


# ---------------------------------- main ------------------------------------ #

if __name__ == "__main__":
    kg = KeyGen(0)  # deterministic: all params derived from jax.random.PRNGKey(0)
    embedding_dim = 32

    params = init_resnet34_params(kg)
    # nn.Linear(512, embedding_dim): weight (E, 512), bias (E,) -> pass W^T to kernel
    bound = 1.0 / jnp.sqrt(512.0)
    lin_w = jax.random.uniform(kg(), (embedding_dim, 512), jnp.float32, -bound, bound)
    lin_b = jax.random.uniform(kg(), (embedding_dim,), jnp.float32, -bound, bound)
    lin_wt = lin_w.T
    # nn.BatchNorm1d default init
    bn_g = jnp.ones((embedding_dim,), jnp.float32)
    bn_b = jnp.zeros((embedding_dim,), jnp.float32)

    # Small input consistent with the module: 3-channel images; 32x32 downsamples
    # through the ResNet-34 stem + 4 stages (total /32) to 1x1 before avgpool.
    images = jax.random.normal(kg(), (2, 3, 32, 32), jnp.float32)

    out = feature_extractor_forward(images, params, lin_wt, lin_b, bn_g, bn_b)
    out = jax.block_until_ready(out)
    assert out.shape == (2, embedding_dim) and out.dtype == jnp.float32
    print("KERNEL_OK")
</pallas_src>

<mosaic_0001>
module attributes {stable_mosaic.version = 11 : i64} {
  func.func @_matmul_stats_kernel(%arg0: i32, %arg1: i32, %arg2: memref<256x256xbf16, #tpu.memory_space<vmem>>, %arg3: memref<256x128xbf16, #tpu.memory_space<vmem>>, %arg4: memref<256x128xf32, #tpu.memory_space<vmem>>, %arg5: memref<8x128xf32, #tpu.memory_space<vmem>>, %arg6: memref<256x128xf32, #tpu.memory_space<vmem>>) attributes {dimension_semantics = [#tpu.dimension_semantics<parallel>, #tpu.dimension_semantics<arbitrary>], iteration_bounds = array<i64: 2, 1>, scalar_prefetch = 0 : i64, scratch_operands = 1 : i64, tpu.core_type = #tpu.core_type<tc>, window_params = [{transform_indices = @transform_0, window_bounds = array<i64: 256, 256>}, {transform_indices = @transform_1, window_bounds = array<i64: 256, 128>}, {transform_indices = @transform_2, window_bounds = array<i64: 256, 128>}, {transform_indices = @transform_3, window_bounds = array<i64: 8, 128>}]} {
    %c0_i32 = arith.constant 0 : i32
    %0 = arith.cmpi eq, %arg1, %c0_i32 : i32
    %1 = arith.extui %0 : i1 to i32
    %c0_i32_0 = arith.constant 0 : i32
    %2 = arith.cmpi ne, %1, %c0_i32_0 : i32
    scf.if %2 {
      %cst_10 = arith.constant 0.000000e+00 : f32
      %12 = vector.broadcast %cst_10 : f32 to vector<256x128xf32>
      %c0_11 = arith.constant 0 : index
      %c0_12 = arith.constant 0 : index
      %13 = vector.load %arg6[%c0_11, %c0_12] : memref<256x128xf32, #tpu.memory_space<vmem>>, vector<256x128xf32>
      tpu.vector_store %arg6[%c0_11, %c0_12], %12 {strides = array<i32>} : memref<256x128xf32, #tpu.memory_space<vmem>>, vector<256x128xf32>,
    } else {
    }
    %c0 = arith.constant 0 : index
    %c0_1 = arith.constant 0 : index
    %3 = vector.load %arg6[%c0, %c0_1] : memref<256x128xf32, #tpu.memory_space<vmem>>, vector<256x128xf32>
    %c0_2 = arith.constant 0 : index
    %c0_3 = arith.constant 0 : index
    %4 = vector.load %arg2[%c0_2, %c0_3] : memref<256x256xbf16, #tpu.memory_space<vmem>>, vector<256x256xbf16>
    %c0_4 = arith.constant 0 : index
    %c0_5 = arith.constant 0 : index
    %5 = vector.load %arg3[%c0_4, %c0_5] : memref<256x128xbf16, #tpu.memory_space<vmem>>, vector<256x128xbf16>
    %cst = arith.constant dense<0.000000e+00> : vector<256x128xf32>
    %6 = tpu.matmul %4, %5, %cst {dimension_numbers = #tpu.dot_dimension_numbers<[1], [0], [0], [1], [0, 0, 1, 1], [], []>} : vector<256x256xbf16>, vector<256x128xbf16>, vector<256x128xf32> -> vector<256x128xf32>
    %7 = arith.addf %3, %6 : vector<256x128xf32>
    %c0_6 = arith.constant 0 : index
    %c0_7 = arith.constant 0 : index
    %8 = vector.load %arg6[%c0_6, %c0_7] : memref<256x128xf32, #tpu.memory_space<vmem>>, vector<256x128xf32>
    tpu.vector_store %arg6[%c0_6, %c0_7], %7 {strides = array<i32>} : memref<256x128xf32, #tpu.memory_space<vmem>>, vector<256x128xf32>,
    %c0_i32_8 = arith.constant 0 : i32
    %9 = arith.cmpi eq, %arg1, %c0_i32_8 : i32
    %10 = arith.extui %9 : i1 to i32
    %c0_i32_9 = arith.constant 0 : i32
    %11 = arith.cmpi ne, %10, %c0_i32_9 : i32
    scf.if %11 {
      %c0_10 = arith.constant 0 : index
      %c0_11 = arith.constant 0 : index
      %12 = vector.load %arg6[%c0_10, %c0_11] : memref<256x128xf32, #tpu.memory_space<vmem>>, vector<256x128xf32>
      %c0_12 = arith.constant 0 : index
      %c0_13 = arith.constant 0 : index
      %13 = vector.load %arg4[%c0_12, %c0_13] : memref<256x128xf32, #tpu.memory_space<vmem>>, vector<256x128xf32>
      tpu.vector_store %arg4[%c0_12, %c0_13], %12 {strides = array<i32>} : memref<256x128xf32, #tpu.memory_space<vmem>>, vector<256x128xf32>,
      %cst_14 = arith.constant dense<0.000000e+00> : vector<128xf32>
      %14 = vector.multi_reduction <add>, %12, %cst_14 [0] : vector<256x128xf32> to vector<128xf32>
      %15 = vector.shape_cast %14 : vector<128xf32> to vector<1x128xf32>
      %c0_15 = arith.constant 0 : index
      %c0_16 = arith.constant 0 : index
      %16 = vector.load %arg5[%c0_15, %c0_16] : memref<8x128xf32, #tpu.memory_space<vmem>>, vector<1x128xf32>
      tpu.vector_store %arg5[%c0_15, %c0_16], %15 {strides = array<i32>} : memref<8x128xf32, #tpu.memory_space<vmem>>, vector<1x128xf32>,
      %17 = arith.mulf %12, %12 : vector<256x128xf32>
      %cst_17 = arith.constant dense<0.000000e+00> : vector<128xf32>
      %18 = vector.multi_reduction <add>, %17, %cst_17 [0] : vector<256x128xf32> to vector<128xf32>
      %19 = vector.shape_cast %18 : vector<128xf32> to vector<1x128xf32>
      %c1 = arith.constant 1 : index
      %c0_18 = arith.constant 0 : index
      %20 = vector.load %arg5[%c1, %c0_18] : memref<8x128xf32, #tpu.memory_space<vmem>>, vector<1x128xf32>
      tpu.vector_store %arg5[%c1, %c0_18], %19 {strides = array<i32>} : memref<8x128xf32, #tpu.memory_space<vmem>>, vector<1x128xf32>,
    } else {
    }
    return
  }
  func.func @transform_0(%arg0: i32, %arg1: i32) -> (i32, i32) {
    %c0_i32 = arith.constant 0 : i32
    return %arg0, %arg1 : i32, i32
  }
  func.func @transform_1(%arg0: i32, %arg1: i32) -> (i32, i32) {
    %c0_i32 = arith.constant 0 : i32
    %c0_i32_0 = arith.constant 0 : i32
    return %arg1, %c0_i32 : i32, i32
  }
  func.func @transform_2(%arg0: i32, %arg1: i32) -> (i32, i32) {
    %c0_i32 = arith.constant 0 : i32
    %c0_i32_0 = arith.constant 0 : i32
    return %arg0, %c0_i32 : i32, i32
  }
  func.func @transform_3(%arg0: i32, %arg1: i32) -> (i32, i32) {
    %c0_i32 = arith.constant 0 : i32
    %c0_i32_0 = arith.constant 0 : i32
    return %arg0, %c0_i32 : i32, i32
  }
}

</mosaic_0001>

<bundles_post_ra>
// kernel: tpu_custom_call.1
= control target key start
LH: loop header
LB: loop body
LE: loop exit
PB: predicated region body
PF: predicated region fallthrough
CT: control target
= control target key end

     0   :  { %9 = vsyncpa [#allocation4], 0  ;;  %s2115_s0 = inlined_call_operand.hbm [shape: bf16[512,256], index: 0, kind: input, shape index: {}]   ;;  %s2116_s1 = inlined_call_operand.hbm [shape: bf16[256,128], index: 1, kind: input, shape index: {}]   ;;  %s2117_s2 = inlined_call_operand.hbm [shape: f32[512,128], index: 2, kind: output, shape index: {0}]   ;;  %s2118_s3 = inlined_call_operand.hbm [shape: f32[16,128], index: 3, kind: output, shape index: {1}]  }
   0x1   :  { %11 = vsyncpa [#allocation4 + $0x1], 0 }
   0x2   :  { %12 = vsyncpa [#allocation7], 0 }
   0x3   :  { %13 = vsyncpa [#allocation5], 0 }
   0x4   :  { %15 = vsyncpa [#allocation5 + $0x1], 0 }
   0x5   :  { %16 = vsyncpa [#allocation10], 0 }
   0x6   :  { %18 = vsyncpa [#allocation10 + $0x1], 0  ;;  %s1741_s12 = smov 0   ;;  %s1743_s13 = smov 0  }
   0x7   :  { %s1745_s14 = smov 0   ;;  %s1747_s15 = smov 0  }
   0x8   :  { %s1749_s16 = smov 0   ;;  %s1751_s17 = smov 0  }
   0x9 LB: > { %s1193_s18 = sadd.s32 4294967295, %s1709_s17   ;;  %s1194_s19 = sadd.s32 4294967294, %s1709_s17   ;;  %s1709_s17 = sphi %s1751_s17, %s24_s17   ;;  %s1705_s16 = sphi %s1749_s16, %s2136_s16   ;;  %s1701_s15 = sphi %s1747_s15, %s2135_s15   ;;  %s1697_s14 = sphi %s1745_s14, %s2134_s14   ;;  %s1693_s13 = sphi %s1743_s13, %s2133_s13   ;;  %s1689_s12 = sphi %s1741_s12, %s2132_s12  }
   0xa   : > { %p58_p0 = scmp.ne.s32.totalorder %s1693_s13, %s1689_s12  ;;  %p1775_p1 = scmp.eq.s32.totalorder %s1193_s18, 0 }
   0xb   : > { %p1779_p2 = scmp.eq.s32.totalorder %s1193_s18, 1  ;;  %p114_p3 = scmp.eq.s32.totalorder %s1194_s19, 1 }
   0xc   : > { %p1785_p4 = por %p1775_p1, %p58_p0  ;;  %p1195_p5 = scmp.ge.s32.totalorder %s1709_s17, 1 }
   0xd   : > { %p1790_p6 = por %p114_p3, %p58_p0  ;;  %p147_p7 = scmp.lt.s32.totalorder %s1709_s17, 3 }
   0xe   : > { %s2122_s22 = scalar_select %p1785_p4, 1, 0 }
   0xf   : > { %s2123_s23 = scalar_select %p1790_p6, 1, 0 }
  0x10   : > { %p1795_p8 = pnand %p1195_p5, %p147_p7  ;;  %s1711_s25 = smov [#allocation6]  }
  0x11   : > { %s162_s26 = sshll.u32 %s1711_s25, 4  ;;  %s36_s28 = sadd.s32 1, %s1705_s16  ;;  %s163_s26 = int_to_ptr.vmem [resolvable:$true] %s162_s26 }
  0x12   : > { %p1403_p9 = pneg %p1795_p8  ;;  %s1552_s29 = scalar_lea.vmem %s163_s26, 2048 }
  0x13   : > { %p1553_p13 = scmp.ne.s32.totalorder %s163_s26, %s1552_s29  ;;  %p1560_p5 = scmp.lt.s32.totalorder %s163_s26, %s163_s26 }
  0x14   : > { %p1804_p11 = pnand %p1403_p9, %p1775_p1  ;;  %p1561_p7 = scmp.lt.s32.totalorder %s1552_s29, %s1552_s29 }
  0x16   : > { %p1543_p12 = pneg %p1804_p11  ;;  %p1562_p6 = por %p1561_p7, %p1560_p5 }
  0x18   : > { %p1555_p0 = pnand %p1553_p13, %p1543_p12 }
  0x1a   : > { %p1556_p3 = pneg %p1555_p0 }
  0x1c   : > { %p1563_p4 = pnand %p1562_p6, %p1556_p3 }
  0x1e   : > { %1566 = shalt.err (!%p1563_p4)
}
  0x1f   : > { %s1712_s30 = smov 64   ;;  %s1713_s4 = smov 4  }
  0x20   : > { %1406 = dma.hbm_to_vmem [thread:$0]  (!%p1804_p11), %s2116_s1, 2048, %s163_s26, [#allocation7], %s1712_s30, %s1712_s30, %s1713_s4  }
  0x21   : > { %p38_p6 = scmp.ge.s32.totalorder %s36_s28, 2  ;;  %s45_s7 = sadd.s32 1, %s1697_s14 }
  0x22   : > { %p52_p4 = scmp.ne.s32.totalorder %s1697_s14, %s1693_s13  ;;  %p53_p9 = scmp.eq.s32.totalorder %s1709_s17, 0 }
  0x23   : > { %s2138_s28 = smov (%p38_p6, %s36_s28), 0  ;;  %p1419_p0 = scmp.lt.s32.totalorder %s1709_s17, 2 }
  0x24   : > { %p1822_p12 = por %p53_p9, %p52_p4  ;;  %p1828_p13 = por %p1779_p2, %p52_p4 }
  0x25   : > { %s40_s10 = ssub.s32 %s1705_s16, %s2138_s28  ;;  %s176_s11 = sand.u32 1, %s1697_s14  }
  0x26   : > { %p43_p11 = scmp.eq.s32.totalorder %s40_s10, 0  ;;  %s1198_s18 = sshll.u32 %s176_s11, 8 }
  0x27   : > { %s1263_s25 = sshll.u32 %s1705_s16, 12  ;;  %s180_s30 = scalar_lea.vmem [#allocation3], %s1198_s18 }
  0x28   : > { %s1837_s19 = scalar_select %p43_p11, %s1697_s14, %s45_s7  }
  0x29   : > { %s189_s29 = scalar_lea.hbm %s2115_s0, %s1263_s25  ;;  %s190_s4 = sshll.u32 %s180_s30, 4  ;;  %s191_s4 = int_to_ptr.vmem [resolvable:$true] %s190_s4 }
  0x2a   : > { %p1845_p2 = pnand %p1419_p0, %p1822_p12  ;;  %s177_s5 = scalar_lea.sflag [#allocation4], %s176_s11 }
  0x2b   : > { %s1580_s6 = scalar_lea.vmem %s191_s4, 4096  ;;  %s1714_s7 = smov [#allocation3]  }
  0x2c   : > { %p1569_p3 = pneg %p1845_p2  ;;  %p1581_p5 = scmp.ne.s32.totalorder %s191_s4, %s1580_s6 }
  0x2d   : > { %s1585_s10 = sshll.u32 %s1714_s7, 4  ;;  %s1586_s10 = int_to_ptr.vmem [resolvable:$false] %s1585_s10 }
  0x2e   : > { %p1583_p7 = pnand %p1581_p5, %p1569_p3  ;;  %s1587_s25 = scalar_lea.vmem %s1586_s10, 8192 }
  0x2f   : > { %p1588_p4 = scmp.lt.s32.totalorder %s191_s4, %s1586_s10  ;;  %p1589_p9 = scmp.lt.s32.totalorder %s1587_s25, %s1580_s6 }
  0x30   : > { %p1584_p6 = pneg %p1583_p7 }
  0x31   : > { %p1590_p11 = por %p1589_p9, %p1588_p4 }
  0x33   : > { %p1591_p10 = pnand %p1590_p11, %p1584_p6 }
  0x35   : > { %1594 = shalt.err (!%p1591_p10)
}
  0x36   : > { %s1715_s8 = smov 128   ;;  %s1716_s18 = smov 8  }
  0x37   : > { %1410 = dma.hbm_to_vmem [thread:$0]  (!%p1845_p2), %s189_s29, 4096, %s191_s4, %s177_s5, %s1715_s8, %s1715_s8, %s1716_s18  }
  0x38   : > { %202 = sbr.rel (%p1795_p8) target bundleno = 425 (0x1a9), region = 28  ;;  %s1856_s11 = sand.u32 (!%p1795_p8), 1, %s1693_s13  }
  0x39   : > { %s1203_s26 = sshll.u32 (!%p1795_p8), %s1856_s11, 8  ;;  %s205_s27 = scalar_lea.sflag (!%p1795_p8), [#allocation4], %s1856_s11 }
  0x3a   : > { %s1862_s30 = scalar_lea.vmem (!%p1795_p8), [#allocation3], %s1203_s26  ;;  %p2129_p10 = scmp.ne.s32.totalorder (!%p1795_p8), %s2122_s22, 0 }
  0x3d   : > { %1672 = dma.done.wait (%p2129_p10), %s205_s27, 4096  }
  0x3e   : > { %1674 = vsyncadd (%p2129_p10), %s205_s27, 4294963200 }
  0x3f   : > { %1676 = dma.done.wait (%p1775_p1), [#allocation7], 2048  }
  0x40   : > { %1678 = vsyncadd (%p1775_p1), [#allocation7], 4294965248  ;;  %v1477_v0 = vld [vmem:[#allocation6 + $0x78] sm:$0xff]   ;;  %v1479_v2 = vld [vmem:[#allocation6 + $0x70] sm:$0xff]   ;;  %s1910_s20 = scalar_lea.vmem [#allocation8], %s1203_s26  ;;  %s1264_s22 = sshll.u32 %s1701_s15, 12 }
  0x41   : > { %v1478_v1 = vld [vmem:[#allocation6 + $0x38] sm:$0xff]   ;;  %1265 = vmatprep.subr.bf16.mxu0 %v1477_v0  ;;  %1377 = vmatprep.subr.bf16.mxu1 %v1477_v0  ;;  %v1480_v3 = vld [vmem:[#allocation6 + $0x30] sm:$0xff]   ;;  %v1481_v4 = vld [vmem:[#allocation6 + $0x68] sm:$0xff]   ;;  %s1052_s24 = sshll.u32 %s1910_s20, 4  ;;  %s1994_s21 = scalar_lea.hbm %s2117_s2, %s1264_s22  ;;  %s1996_s24 = int_to_ptr.vmem [resolvable:$true] %s1052_s24 }
  0x42   : > { %1266 = vmatpush3.bf16.msra.mxu0 %v1478_v1  ;;  %1385 = vmatpush3.bf16.msra.mxu1 %v1478_v1  ;;  %v1482_v5 = vld [vmem:[#allocation6 + $0x28] sm:$0xff]   ;;  %v1483_v6 = vld [vmem:[#allocation6 + $0x60] sm:$0xff]   ;;  %v1485_v8 = vld [vmem:[#allocation6 + $0x58] sm:$0xff]   ;;  %s1034_s5 = scalar_lea.sflag [#allocation5], %s1856_s11  ;;  %s1595_s6 = scalar_lea.vmem %s1996_s24, 4096 }
  0x43   : > { %1267 = vmatprep.subr.bf16.mxu0 %v1479_v2  ;;  %1378 = vmatprep.subr.bf16.mxu1 %v1479_v2  ;;  %v1484_v7 = vld [vmem:[#allocation6 + $0x20] sm:$0xff]   ;;  %v1486_v9 = vld [vmem:[#allocation6 + $0x18] sm:$0xff]   ;;  %v1487_v10 = vld [vmem:[#allocation6 + $0x50] sm:$0xff]   ;;  %p1596_p1 = scmp.ne.s32.totalorder %s1996_s24, %s1595_s6  ;;  %s1717_s7 = smov [#allocation8]  }
  0x44   : > { %v1495_v11 = vld [vmem:[%s1862_s30 + $0x4] ss:$8 sps:$4 sm:$0xff]   ;;  %v1488_v12 = vld [vmem:[#allocation6 + $0x10] sm:$0xff]   ;;  %v1493_v18 = vld [vmem:[%s1862_s30] ss:$8 sps:$4 sm:$0xff]   ;;  %s1599_s10 = sshll.u32 %s1717_s7, 4  ;;  %s1600_s10 = int_to_ptr.vmem [resolvable:$false] %s1599_s10 }
  0x45   : > { %665 = vmatprep.mubr.bf16.mxu0 %v1495_v11  ;;  %v1489_v13 = vld [vmem:[#allocation6 + $0x48] sm:$0xff]   ;;  %v1491_v16 = vld [vmem:[#allocation6 + $0x40] sm:$0xff]   ;;  %v1496_v19 = vld [vmem:[%s1862_s30 + $0x14] ss:$8 sps:$4 sm:$0xff]   ;;  %p1597_p8 = pnand %p1596_p1, %p1828_p13  ;;  %s1601_s25 = scalar_lea.vmem %s1600_s10, 8192 }
  0x46   : > { %1268 = vmatpush3.bf16.msra.mxu0 %v1480_v3  ;;  %1386 = vmatpush3.bf16.msra.mxu1 %v1480_v3  ;;  %v1507_v14 = vld [vmem:[%s1862_s30 + $0x84] ss:$8 sps:$4 sm:$0xff]   ;;  %v1505_v20 = vld [vmem:[%s1862_s30 + $0x80] ss:$8 sps:$4 sm:$0xff]   ;;  %v1511_v21 = vld [vmem:[%s1862_s30 + $0x94] ss:$8 sps:$4 sm:$0xff]   ;;  %p1602_p0 = scmp.lt.s32.totalorder %s1996_s24, %s1600_s10  ;;  %p1603_p2 = scmp.lt.s32.totalorder %s1601_s25, %s1595_s6 }
  0x47   : > { %1269 = vmatprep.subr.bf16.mxu0 %v1481_v4  ;;  %1379 = vmatprep.subr.bf16.mxu1 %v1481_v4  ;;  %v1490_v15 = vld [vmem:[#allocation6 + $0x8] sm:$0xff]   ;;  %v1492_v17 = vld [vmem:[#allocation6] sm:$0xff]   ;;  %v1498_v22 = vld [vmem:[%s1862_s30 + $0x10] ss:$8 sps:$4 sm:$0xff]   ;;  %p1598_p12 = pneg %p1597_p8 }
  0x48   : > { %729 = vmatprep.mubr.bf16.mxu1 %v1507_v14  ;;  %v1499_v23 = vld [vmem:[%s1862_s30 + $0x24] ss:$8 sps:$4 sm:$0xff]   ;;  %v1513_v24 = vld [vmem:[%s1862_s30 + $0x90] ss:$8 sps:$4 sm:$0xff]   ;;  %v1501_v26 = vld [vmem:[%s1862_s30 + $0x20] ss:$8 sps:$4 sm:$0xff]   ;;  %p1604_p3 = por %p1603_p2, %p1602_p0 }
  0x49   : > { %v1517_v25 = vld [vmem:[%s1862_s30 + $0xa4] ss:$8 sps:$4 sm:$0xff]   ;;  %v1502_v27 = vld [vmem:[%s1862_s30 + $0x34] ss:$8 sps:$4 sm:$0xff]   ;;  %v1519_v28 = vld [vmem:[%s1862_s30 + $0xa0] ss:$8 sps:$4 sm:$0xff]  }
  0x4a   : > { %1270 = vmatpush3.bf16.msra.mxu0 %v1482_v5  ;;  %1387 = vmatpush3.bf16.msra.mxu1 %v1482_v5  ;;  %v1523_v29 = vld [vmem:[%s1862_s30 + $0xb4] ss:$8 sps:$4 sm:$0xff]   ;;  %v1504_v30 = vld [vmem:[%s1862_s30 + $0x30] ss:$8 sps:$4 sm:$0xff]   ;;  %v1508_v31 = vld [vmem:[%s1862_s30 + $0x44] ss:$8 sps:$4 sm:$0xff]   ;;  %p1605_p5 = pnand %p1604_p3, %p1598_p12 }
  0x4b   : > { %1271 = vmatprep.subr.bf16.mxu0 %v1483_v6  ;;  %1380 = vmatprep.subr.bf16.mxu1 %v1483_v6  ;;  %v1525_v32 = vld [vmem:[%s1862_s30 + $0xb0] ss:$8 sps:$4 sm:$0xff]   ;;  %v1529_v33 = vld [vmem:[%s1862_s30 + $0xc4] ss:$8 sps:$4 sm:$0xff]   ;;  %v1510_v34 = vld [vmem:[%s1862_s30 + $0x40] ss:$8 sps:$4 sm:$0xff]  }
  0x4c   : > { %v1514_v35 = vld [vmem:[%s1862_s30 + $0x54] ss:$8 sps:$4 sm:$0xff]   ;;  %v1531_v36 = vld [vmem:[%s1862_s30 + $0xc0] ss:$8 sps:$4 sm:$0xff]   ;;  %v1516_v38 = vld [vmem:[%s1862_s30 + $0x50] ss:$8 sps:$4 sm:$0xff]  }
  0x4d   : > { %v1532_v37 = vld [vmem:[%s1862_s30 + $0xd4] ss:$8 sps:$4 sm:$0xff]   ;;  %v1520_v39 = vld [vmem:[%s1862_s30 + $0x64] ss:$8 sps:$4 sm:$0xff]   ;;  %v1534_v40 = vld [vmem:[%s1862_s30 + $0xd0] ss:$8 sps:$4 sm:$0xff]  }
  0x4e   : > { %1272 = vmatpush3.bf16.msra.mxu0 %v1484_v7  ;;  %1388 = vmatpush3.bf16.msra.mxu1 %v1484_v7  ;;  %v1535_v41 = vld [vmem:[%s1862_s30 + $0xe4] ss:$8 sps:$4 sm:$0xff]   ;;  %v1522_v42 = vld [vmem:[%s1862_s30 + $0x60] ss:$8 sps:$4 sm:$0xff]   ;;  %v1526_v43 = vld [vmem:[%s1862_s30 + $0x74] ss:$8 sps:$4 sm:$0xff]  }
  0x4f   : > { %1273 = vmatprep.subr.bf16.mxu0 %v1485_v8  ;;  %1381 = vmatprep.subr.bf16.mxu1 %v1485_v8  ;;  %v1537_v44 = vld [vmem:[%s1862_s30 + $0xe0] ss:$8 sps:$4 sm:$0xff]   ;;  %v1538_v45 = vld [vmem:[%s1862_s30 + $0xf4] ss:$8 sps:$4 sm:$0xff]   ;;  %v1528_v46 = vld [vmem:[%s1862_s30 + $0x70] ss:$8 sps:$4 sm:$0xff]  }
  0x50   : > { %v1540_v47 = vld [vmem:[%s1862_s30 + $0xf0] ss:$8 sps:$4 sm:$0xff]  }
  0x52   : > { %1274 = vmatpush3.bf16.msra.mxu0 %v1486_v9  ;;  %1389 = vmatpush3.bf16.msra.mxu1 %v1486_v9 }
  0x53   : > { %1275 = vmatprep.subr.bf16.mxu0 %v1487_v10  ;;  %1382 = vmatprep.subr.bf16.mxu1 %v1487_v10 }
  0x56   : > { %1276 = vmatpush3.bf16.msra.mxu0 %v1488_v12  ;;  %1390 = vmatpush3.bf16.msra.mxu1 %v1488_v12 }
  0x57   : > { %1277 = vmatprep.subr.bf16.mxu0 %v1489_v13  ;;  %1383 = vmatprep.subr.bf16.mxu1 %v1489_v13 }
  0x5a   : > { %1278 = vmatpush3.bf16.msra.mxu0 %v1490_v15  ;;  %1391 = vmatpush3.bf16.msra.mxu1 %v1490_v15 }
  0x5b   : > { %1279 = vmatprep.subr.bf16.mxu0 %v1491_v16  ;;  %1384 = vmatprep.subr.bf16.mxu1 %v1491_v16 }
  0x5e   : > { %1280 = vmatpush3.bf16.msra.mxu0 %v1492_v17  ;;  %1392 = vmatpush3.bf16.msra.mxu1 %v1492_v17 }
  0x61   : > { %666 = vmatmul.mubr.bf16.vlgmr.msra.gmra.mxu0 %v1493_v18  ;;  %730 = vmatmul.mubr.bf16.vlgmr.msra.gmra.mxu1 %v1505_v20 }
  0x62   : > { %673 = vmatprep.mubr.bf16.mxu0 %v1496_v19  ;;  %737 = vmatprep.mubr.bf16.mxu1 %v1511_v21 }
  0x69   : > { %674 = vmatmul.mubr.bf16.gmra.mxu0 %v1498_v22  ;;  %738 = vmatmul.mubr.bf16.gmra.mxu1 %v1513_v24 }
  0x6a   : > { %681 = vmatprep.mubr.bf16.mxu0 %v1499_v23  ;;  %745 = vmatprep.mubr.bf16.mxu1 %v1517_v25 }
  0x71   : > { %682 = vmatmul.mubr.bf16.gmra.mxu0 %v1501_v26  ;;  %746 = vmatmul.mubr.bf16.gmra.mxu1 %v1519_v28 }
  0x72   : > { %689 = vmatprep.mubr.bf16.mxu0 %v1502_v27  ;;  %753 = vmatprep.mubr.bf16.mxu1 %v1523_v29 }
  0x79   : > { %690 = vmatmul.mubr.bf16.gmra.mxu0 %v1504_v30  ;;  %754 = vmatmul.mubr.bf16.gmra.mxu1 %v1525_v32 }
  0x7a   : > { %697 = vmatprep.mubr.bf16.mxu0 %v1508_v31  ;;  %761 = vmatprep.mubr.bf16.mxu1 %v1529_v33 }
  0x81   : > { %698 = vmatmul.mubr.bf16.gmra.mxu0 %v1510_v34  ;;  %762 = vmatmul.mubr.bf16.gmra.mxu1 %v1531_v36 }
  0x82   : > { %705 = vmatprep.mubr.bf16.mxu0 %v1514_v35  ;;  %769 = vmatprep.mubr.bf16.mxu1 %v1532_v37 }
  0x89   : > { %706 = vmatmul.mubr.bf16.gmra.mxu0 %v1516_v38  ;;  %770 = vmatmul.mubr.bf16.gmra.mxu1 %v1534_v40 }
  0x8a   : > { %713 = vmatprep.mubr.bf16.mxu0 %v1520_v39  ;;  %777 = vmatprep.mubr.bf16.mxu1 %v1535_v41 }
  0x91   : > { %714 = vmatmul.mubr.bf16.gmra.mxu0 %v1522_v42  ;;  %778 = vmatmul.mubr.bf16.gmra.mxu1 %v1537_v44 }
  0x92   : > { %721 = vmatprep.mubr.bf16.mxu0 %v1526_v43  ;;  %785 = vmatprep.mubr.bf16.mxu1 %v1538_v45 }
  0x99   : > { %722 = vmatmul.mubr.bf16.gmra.mxu0 %v1528_v46  ;;  %786 = vmatmul.mubr.bf16.gmra.mxu1 %v1540_v47 }
 0x121   : > { %v1281_v48 = vpop.f32.mrf.mxu0  ;;  %v1329_v49 = vpop.f32.mrf.mxu1 }
 0x123   : > { %v1282_v50 = vpop.f32.mrf.mxu0  ;;  %v1330_v52 = vpop.f32.mrf.mxu1 }
 0x124   : > { %v1904_v51 = vadd.f32 %v1282_v50, %v1281_v48  ;;  %v1906_v54 = vadd.f32 %v1330_v52, %v1329_v49 }
 0x125   : > { %v1284_v53 = vpop.f32.mrf.mxu0  ;;  %v1332_v55 = vpop.f32.mrf.mxu1 }
 0x126   : > { %893 = vst [vmem:[%s1910_s20] sm:$0xff] %v1904_v51  ;;  %909 = vst [vmem:[%s1910_s20 + $0x80] sm:$0xff] %v1906_v54  ;;  %v963_v40 = vmul.f32 %v1904_v51, %v1904_v51 }
 0x127   : > { %v1285_v56 = vpop.f32.mrf.mxu0  ;;  %v1333_v58 = vpop.f32.mrf.mxu1 }
 0x128   : > { %v1286_v57 = vadd.f32 %v1285_v56, %v1284_v53  ;;  %v1916_v60 = vadd.f32 %v1333_v58, %v1332_v55 }
 0x129   : > { %v1287_v59 = vpop.f32.mrf.mxu0  ;;  %v1335_v61 = vpop.f32.mrf.mxu1 }
 0x12a   : > { %894 = vst [vmem:[%s1910_s20 + $0x8] sm:$0xff] %v1286_v57  ;;  %910 = vst [vmem:[%s1910_s20 + $0x88] sm:$0xff] %v1916_v60  ;;  %v964_v35 = vmul.f32 %v1286_v57, %v1286_v57  ;;  %v925_v41 = vadd.f32 %v1286_v57, %v1904_v51 }
 0x12b   : > { %v1288_v62 = vpop.f32.mrf.mxu0  ;;  %v1336_v0 = vpop.f32.mrf.mxu1 }
 0x12c   : > { %v1289_v63 = vadd.f32 %v1288_v62, %v1287_v59  ;;  %v1921_v2 = vadd.f32 %v1336_v0, %v1335_v61  ;;  %v995_v45 = vadd.f32 %v964_v35, %v963_v40 }
 0x12d   : > { %v1290_v1 = vpop.f32.mrf.mxu0  ;;  %v1338_v3 = vpop.f32.mrf.mxu1 }
 0x12e   : > { %895 = vst [vmem:[%s1910_s20 + $0x10] sm:$0xff] %v1289_v63  ;;  %911 = vst [vmem:[%s1910_s20 + $0x90] sm:$0xff] %v1921_v2  ;;  %v965_v42 = vmul.f32 %v1289_v63, %v1289_v63  ;;  %v926_v46 = vadd.f32 %v1289_v63, %v925_v41 }
 0x12f   : > { %v1291_v4 = vpop.f32.mrf.mxu0  ;;  %v1339_v6 = vpop.f32.mrf.mxu1 }
 0x130   : > { %v1292_v5 = vadd.f32 %v1291_v4, %v1290_v1  ;;  %v1926_v8 = vadd.f32 %v1339_v6, %v1338_v3  ;;  %v996_v53 = vadd.f32 %v995_v45, %v965_v42 }
 0x131   : > { %v1293_v7 = vpop.f32.mrf.mxu0  ;;  %v1341_v9 = vpop.f32.mrf.mxu1 }
 0x132   : > { %896 = vst [vmem:[%s1910_s20 + $0x18] sm:$0xff] %v1292_v5  ;;  %912 = vst [vmem:[%s1910_s20 + $0x98] sm:$0xff] %v1926_v8  ;;  %v966_v47 = vmul.f32 %v1292_v5, %v1292_v5  ;;  %v927_v55 = vadd.f32 %v1292_v5, %v926_v46 }
 0x133   : > { %v1294_v10 = vpop.f32.mrf.mxu0  ;;  %v1342_v12 = vpop.f32.mrf.mxu1 }
 0x134   : > { %v1295_v11 = vadd.f32 %v1294_v10, %v1293_v7  ;;  %v1931_v14 = vadd.f32 %v1342_v12, %v1341_v9  ;;  %v997_v58 = vadd.f32 %v996_v53, %v966_v47 }
 0x135   : > { %v1296_v13 = vpop.f32.mrf.mxu0  ;;  %v1344_v15 = vpop.f32.mrf.mxu1 }
 0x136   : > { %897 = vst [vmem:[%s1910_s20 + $0x20] sm:$0xff] %v1295_v11  ;;  %913 = vst [vmem:[%s1910_s20 + $0xa0] sm:$0xff] %v1931_v14  ;;  %v967_v51 = vmul.f32 %v1295_v11, %v1295_v11  ;;  %v928_v59 = vadd.f32 %v1295_v11, %v927_v55 }
 0x137   : > { %v1297_v16 = vpop.f32.mrf.mxu0  ;;  %v1345_v18 = vpop.f32.mrf.mxu1 }
 0x138   : > { %v1298_v17 = vadd.f32 %v1297_v16, %v1296_v13  ;;  %v1936_v20 = vadd.f32 %v1345_v18, %v1344_v15  ;;  %v998_v3 = vadd.f32 %v997_v58, %v967_v51 }
 0x139   : > { %v1299_v19 = vpop.f32.mrf.mxu0  ;;  %v1347_v21 = vpop.f32.mrf.mxu1 }
 0x13a   : > { %898 = vst [vmem:[%s1910_s20 + $0x28] sm:$0xff] %v1298_v17  ;;  %914 = vst [vmem:[%s1910_s20 + $0xa8] sm:$0xff] %v1936_v20  ;;  %v968_v61 = vmul.f32 %v1298_v17, %v1298_v17  ;;  %v929_v4 = vadd.f32 %v1298_v17, %v928_v59 }
 0x13b   : > { %v1300_v22 = vpop.f32.mrf.mxu0  ;;  %v1348_v24 = vpop.f32.mrf.mxu1 }
 0x13c   : > { %v1301_v23 = vadd.f32 %v1300_v22, %v1299_v19  ;;  %v1941_v26 = vadd.f32 %v1348_v24, %v1347_v21  ;;  %v999_v9 = vadd.f32 %v998_v3, %v968_v61 }
 0x13d   : > { %v1302_v25 = vpop.f32.mrf.mxu0  ;;  %v1350_v27 = vpop.f32.mrf.mxu1 }
 0x13e   : > { %899 = vst [vmem:[%s1910_s20 + $0x30] sm:$0xff] %v1301_v23  ;;  %915 = vst [vmem:[%s1910_s20 + $0xb0] sm:$0xff] %v1941_v26  ;;  %v969_v5 = vmul.f32 %v1301_v23, %v1301_v23  ;;  %v930_v10 = vadd.f32 %v1301_v23, %v929_v4 }
 0x13f   : > { %v1303_v28 = vpop.f32.mrf.mxu0  ;;  %v1351_v30 = vpop.f32.mrf.mxu1 }
 0x140   : > { %v1304_v29 = vadd.f32 %v1303_v28, %v1302_v25  ;;  %v1946_v32 = vadd.f32 %v1351_v30, %v1350_v27  ;;  %v1000_v18 = vadd.f32 %v999_v9, %v969_v5 }
 0x141   : > { %v1305_v31 = vpop.f32.mrf.mxu0  ;;  %v1353_v33 = vpop.f32.mrf.mxu1 }
 0x142   : > { %900 = vst [vmem:[%s1910_s20 + $0x38] sm:$0xff] %v1304_v29  ;;  %916 = vst [vmem:[%s1910_s20 + $0xb8] sm:$0xff] %v1946_v32  ;;  %v970_v12 = vmul.f32 %v1304_v29, %v1304_v29  ;;  %v931_v19 = vadd.f32 %v1304_v29, %v930_v10 }
 0x143   : > { %v1306_v34 = vpop.f32.mrf.mxu0  ;;  %v1354_v37 = vpop.f32.mrf.mxu1 }
 0x144   : > { %v1307_v36 = vadd.f32 %v1306_v34, %v1305_v31  ;;  %v1951_v39 = vadd.f32 %v1354_v37, %v1353_v33  ;;  %v1001_v24 = vadd.f32 %v1000_v18, %v970_v12 }
 0x145   : > { %v1308_v38 = vpop.f32.mrf.mxu0  ;;  %v1356_v43 = vpop.f32.mrf.mxu1 }
 0x146   : > { %901 = vst [vmem:[%s1910_s20 + $0x40] sm:$0xff] %v1307_v36  ;;  %917 = vst [vmem:[%s1910_s20 + $0xc0] sm:$0xff] %v1951_v39  ;;  %v971_v17 = vmul.f32 %v1307_v36, %v1307_v36  ;;  %v932_v25 = vadd.f32 %v1307_v36, %v931_v19 }
 0x147   : > { %v1309_v44 = vpop.f32.mrf.mxu0  ;;  %v1357_v49 = vpop.f32.mrf.mxu1 }
 0x148   : > { %v1310_v48 = vadd.f32 %v1309_v44, %v1308_v38  ;;  %v1959_v52 = vadd.f32 %v1357_v49, %v1356_v43  ;;  %v1002_v33 = vadd.f32 %v1001_v24, %v971_v17 }
 0x149   : > { %v1311_v50 = vpop.f32.mrf.mxu0  ;;  %v1359_v56 = vpop.f32.mrf.mxu1 }
 0x14a   : > { %902 = vst [vmem:[%s1910_s20 + $0x48] sm:$0xff] %v1310_v48  ;;  %918 = vst [vmem:[%s1910_s20 + $0xc8] sm:$0xff] %v1959_v52  ;;  %v972_v27 = vmul.f32 %v1310_v48, %v1310_v48  ;;  %v933_v34 = vadd.f32 %v1310_v48, %v932_v25 }
 0x14b   : > { %v1312_v57 = vpop.f32.mrf.mxu0  ;;  %v1360_v63 = vpop.f32.mrf.mxu1 }
 0x14c   : > { %v1313_v62 = vadd.f32 %v1312_v57, %v1311_v50  ;;  %v1964_v1 = vadd.f32 %v1360_v63, %v1359_v56  ;;  %v1003_v38 = vadd.f32 %v1002_v33, %v972_v27 }
 0x14d   : > { %v1314_v0 = vpop.f32.mrf.mxu0  ;;  %v1362_v6 = vpop.f32.mrf.mxu1 }
 0x14e   : > { %903 = vst [vmem:[%s1910_s20 + $0x50] sm:$0xff] %v1313_v62  ;;  %919 = vst [vmem:[%s1910_s20 + $0xd0] sm:$0xff] %v1964_v1  ;;  %v973_v29 = vmul.f32 %v1313_v62, %v1313_v62  ;;  %v934_v40 = vadd.f32 %v1313_v62, %v933_v34 }
 0x14f   : > { %v1315_v7 = vpop.f32.mrf.mxu0  ;;  %v1363_v13 = vpop.f32.mrf.mxu1 }
 0x150   : > { %v1316_v11 = vadd.f32 %v1315_v7, %v1314_v0  ;;  %v1969_v16 = vadd.f32 %v1363_v13, %v1362_v6  ;;  %v1004_v45 = vadd.f32 %v1003_v38, %v973_v29 }
 0x151   : > { %v1317_v15 = vpop.f32.mrf.mxu0  ;;  %v1365_v21 = vpop.f32.mrf.mxu1 }
 0x152   : > { %904 = vst [vmem:[%s1910_s20 + $0x58] sm:$0xff] %v1316_v11  ;;  %920 = vst [vmem:[%s1910_s20 + $0xd8] sm:$0xff] %v1969_v16  ;;  %v974_v41 = vmul.f32 %v1316_v11, %v1316_v11  ;;  %v935_v46 = vadd.f32 %v1316_v11, %v934_v40  ;;  %v979_v11 = vmul.f32 %v1906_v54, %v1906_v54 }
 0x153   : > { %v1318_v22 = vpop.f32.mrf.mxu0  ;;  %v1366_v28 = vpop.f32.mrf.mxu1 }
 0x154   : > { %v1319_v23 = vadd.f32 %v1318_v22, %v1317_v15  ;;  %v1974_v31 = vadd.f32 %v1366_v28, %v1365_v21  ;;  %v1005_v50 = vadd.f32 %v1004_v45, %v974_v41 }
 0x155   : > { %v1320_v30 = vpop.f32.mrf.mxu0  ;;  %v1368_v35 = vpop.f32.mrf.mxu1 }
 0x156   : > { %905 = vst [vmem:[%s1910_s20 + $0x60] sm:$0xff] %v1319_v23  ;;  %921 = vst [vmem:[%s1910_s20 + $0xe0] sm:$0xff] %v1974_v31  ;;  %v975_v47 = vmul.f32 %v1319_v23, %v1319_v23  ;;  %v936_v53 = vadd.f32 %v1319_v23, %v935_v46 }
 0x157   : > { %v1321_v37 = vpop.f32.mrf.mxu0  ;;  %v1369_v42 = vpop.f32.mrf.mxu1 }
 0x158   : > { %v1322_v36 = vadd.f32 %v1321_v37, %v1320_v30  ;;  %v1979_v44 = vadd.f32 %v1369_v42, %v1368_v35  ;;  %v1006_v59 = vadd.f32 %v1005_v50, %v975_v47 }
 0x159   : > { %v1323_v43 = vpop.f32.mrf.mxu0  ;;  %v1371_v48 = vpop.f32.mrf.mxu1 }
 0x15a   : > { %906 = vst [vmem:[%s1910_s20 + $0x68] sm:$0xff] %v1322_v36  ;;  %922 = vst [vmem:[%s1910_s20 + $0xe8] sm:$0xff] %v1979_v44  ;;  %v976_v55 = vmul.f32 %v1322_v36, %v1322_v36  ;;  %v937_v61 = vadd.f32 %v1322_v36, %v936_v53 }
 0x15b   : > { %v1324_v49 = vpop.f32.mrf.mxu0  ;;  %v1372_v56 = vpop.f32.mrf.mxu1 }
 0x15c   : > { %v1325_v51 = vadd.f32 %v1324_v49, %v1323_v43  ;;  %v1984_v58 = vadd.f32 %v1372_v56, %v1371_v48  ;;  %v1007_v3 = vadd.f32 %v1006_v59, %v976_v55 }
 0x15d   : > { %v1326_v57 = vpop.f32.mrf.mxu0  ;;  %v1374_v63 = vpop.f32.mrf.mxu1 }
 0x15e   : > { %907 = vst [vmem:[%s1910_s20 + $0x70] sm:$0xff] %v1325_v51  ;;  %v977_v62 = vmul.f32 %v1325_v51, %v1325_v51  ;;  %923 = vst [vmem:[%s1910_s20 + $0xf0] sm:$0xff] %v1984_v58  ;;  %v938_v4 = vadd.f32 %v1325_v51, %v937_v61 }
 0x15f   : > { %v1327_v0 = vpop.f32.mrf.mxu0  ;;  %v1375_v6 = vpop.f32.mrf.mxu1 }
 0x160   : > { %v1328_v5 = vadd.f32 %v1327_v0, %v1326_v57  ;;  %v1998_v7 = vadd.f32 %v1375_v6, %v1374_v63  ;;  %v1008_v9 = vadd.f32 %v1007_v3, %v977_v62 }
 0x162   : > { %908 = vst [vmem:[%s1910_s20 + $0x78] sm:$0xff] %v1328_v5  ;;  %v939_v10 = vadd.f32 %v1328_v5, %v938_v4  ;;  %v978_v12 = vmul.f32 %v1328_v5, %v1328_v5  ;;  %924 = vst [vmem:[%s1910_s20 + $0xf8] sm:$0xff] %v1998_v7 }
 0x164   : > { %v940_v13 = vadd.f32 %v1906_v54, %v939_v10  ;;  %v1009_v15 = vadd.f32 %v1008_v9, %v978_v12 }
 0x165   : > { %1608 = shalt.err (!%p1605_p5)
}
 0x166   : > { %s1609_s8 = scalar_lea.hbm %s1994_s21, 4096  ;;  %s1613_s27 = scalar_lea.hbm %s2117_s2, 8192 }
 0x167   : > { %p1610_p7 = scmp.ne.s32.totalorder %s1994_s21, %s1609_s8  ;;  %p1614_p9 = scmp.lt.s32.totalorder %s1994_s21, %s2117_s2 }
 0x168   : > { %p1615_p11 = scmp.lt.s32.totalorder %s1613_s27, %s1609_s8 }
 0x169   : > { %p1611_p6 = pnand %p1610_p7, %p1828_p13 }
 0x16a   : > { %p1616_p10 = por %p1615_p11, %p1614_p9 }
 0x16b   : > { %p1612_p4 = pneg %p1611_p6 }
 0x16d   : > { %p1617_p1 = pnand %p1616_p10, %p1612_p4 }
 0x16f   : > { %1620 = shalt.err (!%p1617_p1)
}
 0x170   : > { %s1718_s22 = smov 128   ;;  %s1719_s29 = smov 8   ;;  %v980_v54 = vmul.f32 %v1916_v60, %v1916_v60  ;;  %v941_v18 = vadd.f32 %v1916_v60, %v940_v13  ;;  %v1010_v19 = vadd.f32 %v1009_v15, %v979_v11  ;;  %v981_v17 = vmul.f32 %v1921_v2, %v1921_v2 }
 0x171   : > { %1399 = dma.vmem_to_hbm [thread:$0]  (%p1828_p13), %s1996_s24, 4096, %s1994_s21, %s1034_s5, %s1718_s22, %s1718_s22, %s1719_s29   ;;  %v982_v24 = vmul.f32 %v1926_v8, %v1926_v8  ;;  %v983_v23 = vmul.f32 %v1931_v14, %v1931_v14  ;;  %v984_v60 = vmul.f32 %v1936_v20, %v1936_v20  ;;  %v988_v36 = vmul.f32 %v1959_v52, %v1959_v52 }
 0x172   : > { %v942_v21 = vadd.f32 %v1921_v2, %v941_v18  ;;  %v1011_v22 = vadd.f32 %v1010_v19, %v980_v54  ;;  %v985_v2 = vmul.f32 %v1941_v26, %v1941_v26  ;;  %v989_v45 = vmul.f32 %v1964_v1, %v1964_v1  ;;  %s1206_s24 = sshll.u32 %s1856_s11, 3  ;;  %s1259_s4 = sshll.u32 %s1701_s15, 7 }
 0x173   : > { %v990_v47 = vmul.f32 %v1969_v16, %v1969_v16  ;;  %v992_v53 = vmul.f32 %v1979_v44, %v1979_v44  ;;  %v994_v57 = vmul.f32 %v1998_v7, %v1998_v7  ;;  %s239_s21 = scalar_lea.vmem [#allocation9], %s1206_s24  ;;  %s1066_s10 = scalar_lea.hbm %s2118_s3, %s1259_s4 }
 0x174   : > { %v943_v25 = vadd.f32 %v1926_v8, %v942_v21  ;;  %v1012_v27 = vadd.f32 %v1011_v22, %v981_v17  ;;  %v986_v8 = vmul.f32 %v1946_v32, %v1946_v32  ;;  %s1068_s5 = sshll.u32 %s239_s21, 4  ;;  %s1039_s25 = scalar_lea.sflag [#allocation10], %s1856_s11  ;;  %s1069_s5 = int_to_ptr.vmem [resolvable:$true] %s1068_s5 }
 0x175   : > { %s1621_s8 = scalar_lea.vmem %s1069_s5, 128  ;;  %s1720_s18 = smov [#allocation9]  }
 0x176   : > { %v1013_v28 = vadd.f32 %v1012_v27, %v982_v24  ;;  %v944_v30 = vadd.f32 %v1931_v14, %v943_v25  ;;  %v987_v14 = vmul.f32 %v1951_v39, %v1951_v39  ;;  %p1622_p8 = scmp.ne.s32.totalorder %s1069_s5, %s1621_s8  ;;  %s1625_s15 = sshll.u32 %s1720_s18, 4  ;;  %s1626_s15 = int_to_ptr.vmem [resolvable:$false] %s1625_s15 }
 0x177   : > { %s1627_s26 = scalar_lea.vmem %s1626_s15, 256  ;;  %p1628_p2 = scmp.lt.s32.totalorder %s1069_s5, %s1626_s15 }
 0x178   : > { %v945_v33 = vadd.f32 %v1936_v20, %v944_v30  ;;  %v1014_v34 = vadd.f32 %v1013_v28, %v983_v23  ;;  %p1623_p12 = pnand %p1622_p8, %p1828_p13  ;;  %p1629_p3 = scmp.lt.s32.totalorder %s1627_s26, %s1621_s8 }
 0x17a   : > { %v946_v29 = vadd.f32 %v1941_v26, %v945_v33  ;;  %v1015_v35 = vadd.f32 %v1014_v34, %v984_v60  ;;  %p1624_p0 = pneg %p1623_p12  ;;  %p1630_p5 = por %p1629_p3, %p1628_p2 }
 0x17c   : > { %v947_v37 = vadd.f32 %v1946_v32, %v946_v29  ;;  %v1016_v38 = vadd.f32 %v1015_v35, %v985_v2  ;;  %p1631_p7 = pnand %p1630_p5, %p1624_p0 }
 0x17e   : > { %v948_v40 = vadd.f32 %v1951_v39, %v947_v37  ;;  %v1017_v41 = vadd.f32 %v1016_v38, %v986_v8 }
 0x180   : > { %v949_v20 = vadd.f32 %v1959_v52, %v948_v40  ;;  %v1018_v42 = vadd.f32 %v1017_v41, %v987_v14  ;;  %v991_v52 = vmul.f32 %v1974_v31, %v1974_v31 }
 0x182   : > { %v1019_v26 = vadd.f32 %v1018_v42, %v988_v36  ;;  %v950_v43 = vadd.f32 %v1964_v1, %v949_v20 }
 0x184   : > { %v1020_v32 = vadd.f32 %v1019_v26, %v989_v45  ;;  %v951_v46 = vadd.f32 %v1969_v16, %v950_v43  ;;  %v993_v16 = vmul.f32 %v1984_v58, %v1984_v58 }
 0x186   : > { %v1021_v39 = vadd.f32 %v1020_v32, %v990_v47  ;;  %v952_v48 = vadd.f32 %v1974_v31, %v951_v46 }
 0x188   : > { %v1022_v49 = vadd.f32 %v1021_v39, %v991_v52  ;;  %v953_v50 = vadd.f32 %v1979_v44, %v952_v48 }
 0x18a   : > { %v1023_v1 = vadd.f32 %v1022_v49, %v992_v53  ;;  %v954_v55 = vadd.f32 %v1984_v58, %v953_v50 }
 0x18c   : > { %v1024_v51 = vadd.f32 %v1023_v1, %v993_v16  ;;  %v955_v56 = vadd.f32 %v1998_v7, %v954_v55 }
 0x18e   : > { %v956_v31 = vrot.slane %v955_v56, 4  ;;  %v1025_v59 = vadd.f32 %v1024_v51, %v994_v57 }
 0x190   : > { %v957_v61 = vadd.f32 %v956_v31, %v955_v56  ;;  %v1026_v62 = vrot.slane %v1025_v59, 4 }
 0x192   : > { %v958_v63 = vrot.slane %v957_v61, 2  ;;  %v1027_v44 = vadd.f32 %v1026_v62, %v1025_v59 }
 0x194   : > { %v959_v0 = vadd.f32 %v958_v63, %v957_v61  ;;  %v1028_v3 = vrot.slane %v1027_v44, 2 }
 0x196   : > { %v960_v4 = vrot.slane %v959_v0, 1  ;;  %v1029_v5 = vadd.f32 %v1028_v3, %v1027_v44 }
 0x198   : > { %v961_v58 = vadd.f32 %v960_v4, %v959_v0  ;;  %v1030_v6 = vrot.slane %v1029_v5, 1 }
 0x19a   : > { %962 = vst [vmem:[%s239_s21] sm:$0x1] %v961_v58  ;;  %v1031_v7 = vadd.f32 %v1030_v6, %v1029_v5 }
 0x19c   : > { %1032 = vst [vmem:[%s239_s21 + $0x1] sm:$0x1] %v1031_v7 }
 0x19d   : > { %1634 = shalt.err (!%p1631_p7)
}
 0x19e   : > { %s1635_s27 = scalar_lea.hbm %s1066_s10, 128  ;;  %s1639_s20 = scalar_lea.hbm %s2118_s3, 256 }
 0x19f   : > { %p1636_p6 = scmp.ne.s32.totalorder %s1066_s10, %s1635_s27  ;;  %p1640_p11 = scmp.lt.s32.totalorder %s1066_s10, %s2118_s3 }
 0x1a0   : > { %p1641_p10 = scmp.lt.s32.totalorder %s1639_s20, %s1635_s27 }
 0x1a1   : > { %p1637_p4 = pnand %p1636_p6, %p1828_p13 }
 0x1a2   : > { %p1642_p1 = por %p1641_p10, %p1640_p11 }
 0x1a3   : > { %p1638_p9 = pneg %p1637_p4 }
 0x1a5   : > { %p1643_p8 = pnand %p1642_p1, %p1638_p9 }
 0x1a7   : > { %1646 = shalt.err (!%p1643_p8)
}
 0x1a8   : > { %1400 = dma.vmem_to_hbm [thread:$0]  (%p1828_p13), %s1069_s5, 128, %s1066_s10, %s1039_s25  }
 0x1a9 PF: > { %s1080_s24 = sand.u32 1, %s1689_s12   ;;  %p2130_p12 = scmp.ne.s32.totalorder %s2123_s23, 0 }
 0x1aa   : > { %p2131_p0 = scmp.ge.s32.totalorder %s1709_s17, 2  ;;  %s1081_s4 = scalar_lea.sflag [#allocation5], %s1080_s24 }
 0x1ac   : > { %p1412_p2 = pnand %p2131_p0, %p2130_p12 }
 0x1ae   : > { %p1413_p3 = pneg %p1412_p2 }
 0x1b0   : > { %1680 = dma.done.wait (%p1413_p3), %s1081_s4, 4096  }
 0x1b1   : > { %1682 = vsyncadd (%p1413_p3), %s1081_s4, 4294963200  ;;  %s1090_s21 = scalar_lea.sflag [#allocation10], %s1080_s24 }
 0x1b2   : > { %1684 = dma.done.wait (%p1413_p3), %s1090_s21, 128  }
 0x1b3   : > { %1686 = vsyncadd (%p1413_p3), %s1090_s21, 4294967168  ;;  %s24_s17 = sadd.s32 1, %s1709_s17   ;;  %s2132_s12 = smov %s1693_s13 }
 0x1b4   : > { %p21_p5 = scmp.ge.s32.totalorder %s24_s17, 4   ;;  %s2133_s13 = smov %s1697_s14 }
 0x1b5   : > { %s2134_s14 = smov %s1837_s19  ;;  %s2135_s15 = smov %s1705_s16 }
 0x1b6   : > { %s2136_s16 = smov %s2138_s28  ;;  %23 = sbr.rel (!%p21_p5) target bundleno = 9 (0x9), region = 103 }
 0x1bb   :  { %1095 = vsyncpa [#allocation4], 1 }
 0x1bc   :  { %1097 = vsyncpa [#allocation4 + $0x1], 1 }
 0x1bd   :  { %1098 = vsyncpa [#allocation7], 1 }
 0x1be   :  { %1099 = vsyncpa [#allocation5], 1 }
 0x1bf   :  { %1101 = vsyncpa [#allocation5 + $0x1], 1 }
 0x1c0   :  { %1102 = vsyncpa [#allocation10], 1 }
 0x1c1   :  { %1104 = vsyncpa [#allocation10 + $0x1], 1 }

</bundles_post_ra>
